<compile_context>
chip_gen: v7x
topology: tpu7x:2x2x1
jax: 0.10.0
libtpu: 0.0.40
codegen_flags: <defaults>
</compile_context>

<pallas_src>
import functools

import jax
import jax.numpy as jnp
from jax.experimental import pallas as pl
from jax.experimental.pallas import tpu as pltpu

DROPOUT_RATES = (0.1, 0.2, 0.3, 0.4, 0.5)
_LANE = 128


def _round_up(x, m):
    return (x + m - 1) // m * m


def _fmix32(x):
    """murmur3-style 32-bit finalizer on uint32 arrays (pure VPU ops)."""
    x = x ^ (x >> 16)
    x = x * jnp.uint32(0x7FEB352D)
    x = x ^ (x >> 15)
    x = x * jnp.uint32(0x846CA68B)
    x = x ^ (x >> 16)
    return x


def msd_kernel(seed_ref, x_ref, w_ref, b_ref, o_ref, *, tile_b, feat_pad):
    x = x_ref[...]                                               # (TB, Fp) f32

    # Global element counter: unique per element across the whole (padded) batch,
    # so every grid step / TensorCore gets a decorrelated mask stream and the
    # result does not depend on the tiling.
    shape = x.shape
    row = jax.lax.broadcasted_iota(jnp.int32, shape, 0) + pl.program_id(0) * tile_b
    col = jax.lax.broadcasted_iota(jnp.int32, shape, 1)
    ctr = (row * feat_pad + col).astype(jnp.uint32)
    seed = seed_ref[0].astype(jnp.uint32)

    # Accumulate per-element keep weight:  w_tot = sum_i keep_i * (1/5)/(1-p_i)
    w_tot = jnp.zeros(shape, jnp.float32)
    for i, p in enumerate(DROPOUT_RATES):
        salt = jnp.uint32((i * 0x85EBCA6B + 0x1B873593) & 0xFFFFFFFF)
        bits = _fmix32((ctr * jnp.uint32(0x9E3779B9)) ^ (seed + salt))
        drop_thresh = jnp.uint32(int(round(p * 2**32)) & 0xFFFFFFFF)  # keep iff bits >= thresh
        scale = jnp.float32((1.0 / len(DROPOUT_RATES)) / (1.0 - p))
        w_tot = w_tot + jnp.where(bits >= drop_thresh, scale, jnp.float32(0.0))

    # Single shared linear head on the MXU (bf16 operands, f32 accumulation).
    xd = (w_tot * x).astype(jnp.bfloat16)
    out = jnp.dot(xd, w_ref[...], preferred_element_type=jnp.float32) + b_ref[...]
    o_ref[...] = out.astype(o_ref.dtype)


def prepare_head_params(weight, bias):
    """One-time prep: transpose to (F, O), pad to lane multiples, cast W to bf16."""
    out_size, feat = weight.shape
    feat_p, out_p = _round_up(feat, _LANE), _round_up(out_size, _LANE)
    w_t = jnp.zeros((feat_p, out_p), jnp.bfloat16)
    w_t = w_t.at[:feat, :out_size].set(weight.T.astype(jnp.bfloat16))
    b2 = jnp.zeros((1, out_p), jnp.float32)
    b2 = b2.at[:, :out_size].set(bias.astype(jnp.float32))
    return w_t, b2


@functools.partial(jax.jit, static_argnames=("out_size",))
def multi_sample_dropout(x, w_t, b2, seed, *, out_size):
    """x: (B, F); w_t: (Fp, Op) bf16 from prepare_head_params; b2: (1, Op) f32."""
    batch, feat = x.shape
    feat_p, out_p = w_t.shape

    # Batch tile: big enough to hide DMA, small enough for v7x's 64 MiB VMEM
    # (2*TB*Fp*4 + Fp*Op*2 + 2*TB*Op*4 stays well under budget for TB=256).
    tile_b = min(256, _round_up(batch, 8))
    batch_p = _round_up(batch, tile_b)

    xp = jnp.zeros((batch_p, feat_p), jnp.float32).at[:batch, :feat].set(
        x.astype(jnp.float32))
    seed_arr = jnp.asarray(seed, dtype=jnp.int32).reshape((1,))

    out_pad = pl.pallas_call(
        functools.partial(msd_kernel, tile_b=tile_b, feat_pad=feat_p),
        out_shape=jax.ShapeDtypeStruct((batch_p, out_p), jnp.float32),
        grid_spec=pltpu.PrefetchScalarGridSpec(
            num_scalar_prefetch=1,
            grid=(batch_p // tile_b,),
            in_specs=[
                pl.BlockSpec((tile_b, feat_p), lambda i, seed: (i, 0)),
                pl.BlockSpec((feat_p, out_p), lambda i, seed: (0, 0)),  # VMEM-resident
                pl.BlockSpec((1, out_p), lambda i, seed: (0, 0)),       # VMEM-resident
            ],
            out_specs=pl.BlockSpec((tile_b, out_p), lambda i, seed: (i, 0)),
        ),
        compiler_params=pltpu.CompilerParams(
            dimension_semantics=("parallel",),      # megacore shard on v7x
            vmem_limit_bytes=64 * 1024 * 1024,
        ),
    )(seed_arr, xp, w_t, b2)

    return out_pad[:batch, :out_size].astype(x.dtype)


if __name__ == "__main__":
    key = jax.random.PRNGKey(0)
    k_x, k_w, k_b = jax.random.split(key, 3)

    batch, feature_size, out_size = 8, 32, 16

    x = jax.random.normal(k_x, (batch, feature_size), dtype=jnp.float32)
    # Deterministic "nn.Linear(feature_size, out_size)" parameters (PyTorch layout).
    bound = 1.0 / (feature_size ** 0.5)
    weight = jax.random.uniform(k_w, (out_size, feature_size),
                                minval=-bound, maxval=bound, dtype=jnp.float32)
    bias = jax.random.uniform(k_b, (out_size,),
                              minval=-bound, maxval=bound, dtype=jnp.float32)

    w_t, b2 = prepare_head_params(weight, bias)
    out = multi_sample_dropout(x, w_t, b2, 1234, out_size=out_size)
    jax.block_until_ready(out)

    assert out.shape == (batch, out_size)
    assert bool(jnp.all(jnp.isfinite(out)))
    print("KERNEL_OK")
</pallas_src>

<mosaic_0001>
module attributes {stable_mosaic.version = 11 : i64} {
  func.func @msd_kernel(%arg0: i32, %arg1: memref<1xi32, #tpu.memory_space<smem>>, %arg2: memref<8x128xf32, #tpu.memory_space<vmem>>, %arg3: memref<128x128xbf16, #tpu.memory_space<vmem>>, %arg4: memref<1x128xf32, #tpu.memory_space<vmem>>, %arg5: memref<8x128xf32, #tpu.memory_space<vmem>>) attributes {dimension_semantics = [#tpu.dimension_semantics<parallel>], iteration_bounds = array<i64: 1>, scalar_prefetch = 1 : i64, scratch_operands = 0 : i64, tpu.core_type = #tpu.core_type<tc>, window_params = [{transform_indices = @transform_0, window_bounds = array<i64: 8, 128>}, {pipeline_mode = #tpu.pipeline_mode<synchronous>, transform_indices = @transform_1, window_bounds = array<i64: 128, 128>}, {pipeline_mode = #tpu.pipeline_mode<synchronous>, transform_indices = @transform_2, window_bounds = array<i64: 1, 128>}, {transform_indices = @transform_3, window_bounds = array<i64: 8, 128>}]} {
    %c0 = arith.constant 0 : index
    %c0_0 = arith.constant 0 : index
    %0 = vector.load %arg2[%c0, %c0_0] : memref<8x128xf32, #tpu.memory_space<vmem>>, vector<8x128xf32>
    %1 = tpu.iota {dimensions = array<i32: 0>} : vector<8x128xi32>
    %c8_i32 = arith.constant 8 : i32
    %2 = arith.muli %arg0, %c8_i32 : i32
    %3 = vector.broadcast %2 : i32 to vector<8x128xi32>
    %4 = arith.addi %1, %3 : vector<8x128xi32>
    %5 = tpu.iota {dimensions = array<i32: 1>} : vector<8x128xi32>
    %c128_i32 = arith.constant 128 : i32
    %6 = vector.broadcast %c128_i32 : i32 to vector<8x128xi32>
    %7 = arith.muli %4, %6 : vector<8x128xi32>
    %8 = arith.addi %7, %5 : vector<8x128xi32>
    %c0_1 = arith.constant 0 : index
    %9 = memref.load %arg1[%c0_1] : memref<1xi32, #tpu.memory_space<smem>>
    %cst = arith.constant 0.000000e+00 : f32
    %10 = vector.broadcast %cst : f32 to vector<8x128xf32>
    %c-1640531527_i32 = arith.constant -1640531527 : i32
    %11 = vector.broadcast %c-1640531527_i32 : i32 to vector<8x128xi32>
    %12 = arith.muli %8, %11 : vector<8x128xi32>
    %c461845907_i32 = arith.constant 461845907 : i32
    %13 = arith.addi %9, %c461845907_i32 : i32
    %14 = vector.broadcast %13 : i32 to vector<8x128xi32>
    %15 = arith.xori %12, %14 : vector<8x128xi32>
    %c16_i32 = arith.constant 16 : i32
    %16 = vector.broadcast %c16_i32 : i32 to vector<8x128xi32>
    %17 = arith.shrui %15, %16 : vector<8x128xi32>
    %18 = arith.xori %15, %17 : vector<8x128xi32>
    %c2146121005_i32 = arith.constant 2146121005 : i32
    %19 = vector.broadcast %c2146121005_i32 : i32 to vector<8x128xi32>
    %20 = arith.muli %18, %19 : vector<8x128xi32>
    %c15_i32 = arith.constant 15 : i32
    %21 = vector.broadcast %c15_i32 : i32 to vector<8x128xi32>
    %22 = arith.shrui %20, %21 : vector<8x128xi32>
    %23 = arith.xori %20, %22 : vector<8x128xi32>
    %c-2073254261_i32 = arith.constant -2073254261 : i32
    %24 = vector.broadcast %c-2073254261_i32 : i32 to vector<8x128xi32>
    %25 = arith.muli %23, %24 : vector<8x128xi32>
    %c16_i32_2 = arith.constant 16 : i32
    %26 = vector.broadcast %c16_i32_2 : i32 to vector<8x128xi32>
    %27 = arith.shrui %25, %26 : vector<8x128xi32>
    %28 = arith.xori %25, %27 : vector<8x128xi32>
    %c429496730_i32 = arith.constant 429496730 : i32
    %29 = vector.broadcast %c429496730_i32 : i32 to vector<8x128xi32>
    %30 = arith.cmpi uge, %28, %29 : vector<8x128xi32>
    %cst_3 = arith.constant 0.222222224 : f32
    %cst_4 = arith.constant 0.000000e+00 : f32
    %31 = vector.broadcast %cst_3 : f32 to vector<8x128xf32>
    %32 = vector.broadcast %cst_4 : f32 to vector<8x128xf32>
    %33 = arith.select %30, %31, %32 : vector<8x128xi1>, vector<8x128xf32>
    %34 = arith.addf %10, %33 : vector<8x128xf32>
    %c-1640531527_i32_5 = arith.constant -1640531527 : i32
    %35 = vector.broadcast %c-1640531527_i32_5 : i32 to vector<8x128xi32>
    %36 = arith.muli %8, %35 : vector<8x128xi32>
    %c-1586298882_i32 = arith.constant -1586298882 : i32
    %37 = arith.addi %9, %c-1586298882_i32 : i32
    %38 = vector.broadcast %37 : i32 to vector<8x128xi32>
    %39 = arith.xori %36, %38 : vector<8x128xi32>
    %c16_i32_6 = arith.constant 16 : i32
    %40 = vector.broadcast %c16_i32_6 : i32 to vector<8x128xi32>
    %41 = arith.shrui %39, %40 : vector<8x128xi32>
    %42 = arith.xori %39, %41 : vector<8x128xi32>
    %c2146121005_i32_7 = arith.constant 2146121005 : i32
    %43 = vector.broadcast %c2146121005_i32_7 : i32 to vector<8x128xi32>
    %44 = arith.muli %42, %43 : vector<8x128xi32>
    %c15_i32_8 = arith.constant 15 : i32
    %45 = vector.broadcast %c15_i32_8 : i32 to vector<8x128xi32>
    %46 = arith.shrui %44, %45 : vector<8x128xi32>
    %47 = arith.xori %44, %46 : vector<8x128xi32>
    %c-2073254261_i32_9 = arith.constant -2073254261 : i32
    %48 = vector.broadcast %c-2073254261_i32_9 : i32 to vector<8x128xi32>
    %49 = arith.muli %47, %48 : vector<8x128xi32>
    %c16_i32_10 = arith.constant 16 : i32
    %50 = vector.broadcast %c16_i32_10 : i32 to vector<8x128xi32>
    %51 = arith.shrui %49, %50 : vector<8x128xi32>
    %52 = arith.xori %49, %51 : vector<8x128xi32>
    %c858993459_i32 = arith.constant 858993459 : i32
    %53 = vector.broadcast %c858993459_i32 : i32 to vector<8x128xi32>
    %54 = arith.cmpi uge, %52, %53 : vector<8x128xi32>
    %cst_11 = arith.constant 2.500000e-01 : f32
    %cst_12 = arith.constant 0.000000e+00 : f32
    %55 = vector.broadcast %cst_11 : f32 to vector<8x128xf32>
    %56 = vector.broadcast %cst_12 : f32 to vector<8x128xf32>
    %57 = arith.select %54, %55, %56 : vector<8x128xi1>, vector<8x128xf32>
    %58 = arith.addf %34, %57 : vector<8x128xf32>
    %c-1640531527_i32_13 = arith.constant -1640531527 : i32
    %59 = vector.broadcast %c-1640531527_i32_13 : i32 to vector<8x128xi32>
    %60 = arith.muli %8, %59 : vector<8x128xi32>
    %c660523625_i32 = arith.constant 660523625 : i32
    %61 = arith.addi %9, %c660523625_i32 : i32
    %62 = vector.broadcast %61 : i32 to vector<8x128xi32>
    %63 = arith.xori %60, %62 : vector<8x128xi32>
    %c16_i32_14 = arith.constant 16 : i32
    %64 = vector.broadcast %c16_i32_14 : i32 to vector<8x128xi32>
    %65 = arith.shrui %63, %64 : vector<8x128xi32>
    %66 = arith.xori %63, %65 : vector<8x128xi32>
    %c2146121005_i32_15 = arith.constant 2146121005 : i32
    %67 = vector.broadcast %c2146121005_i32_15 : i32 to vector<8x128xi32>
    %68 = arith.muli %66, %67 : vector<8x128xi32>
    %c15_i32_16 = arith.constant 15 : i32
    %69 = vector.broadcast %c15_i32_16 : i32 to vector<8x128xi32>
    %70 = arith.shrui %68, %69 : vector<8x128xi32>
    %71 = arith.xori %68, %70 : vector<8x128xi32>
    %c-2073254261_i32_17 = arith.constant -2073254261 : i32
    %72 = vector.broadcast %c-2073254261_i32_17 : i32 to vector<8x128xi32>
    %73 = arith.muli %71, %72 : vector<8x128xi32>
    %c16_i32_18 = arith.constant 16 : i32
    %74 = vector.broadcast %c16_i32_18 : i32 to vector<8x128xi32>
    %75 = arith.shrui %73, %74 : vector<8x128xi32>
    %76 = arith.xori %73, %75 : vector<8x128xi32>
    %c1288490189_i32 = arith.constant 1288490189 : i32
    %77 = vector.broadcast %c1288490189_i32 : i32 to vector<8x128xi32>
    %78 = arith.cmpi uge, %76, %77 : vector<8x128xi32>
    %cst_19 = arith.constant 0.285714298 : f32
    %cst_20 = arith.constant 0.000000e+00 : f32
    %79 = vector.broadcast %cst_19 : f32 to vector<8x128xf32>
    %80 = vector.broadcast %cst_20 : f32 to vector<8x128xf32>
    %81 = arith.select %78, %79, %80 : vector<8x128xi1>, vector<8x128xf32>
    %82 = arith.addf %58, %81 : vector<8x128xf32>
    %c-1640531527_i32_21 = arith.constant -1640531527 : i32
    %83 = vector.broadcast %c-1640531527_i32_21 : i32 to vector<8x128xi32>
    %84 = arith.muli %8, %83 : vector<8x128xi32>
    %c-1387621164_i32 = arith.constant -1387621164 : i32
    %85 = arith.addi %9, %c-1387621164_i32 : i32
    %86 = vector.broadcast %85 : i32 to vector<8x128xi32>
    %87 = arith.xori %84, %86 : vector<8x128xi32>
    %c16_i32_22 = arith.constant 16 : i32
    %88 = vector.broadcast %c16_i32_22 : i32 to vector<8x128xi32>
    %89 = arith.shrui %87, %88 : vector<8x128xi32>
    %90 = arith.xori %87, %89 : vector<8x128xi32>
    %c2146121005_i32_23 = arith.constant 2146121005 : i32
    %91 = vector.broadcast %c2146121005_i32_23 : i32 to vector<8x128xi32>
    %92 = arith.muli %90, %91 : vector<8x128xi32>
    %c15_i32_24 = arith.constant 15 : i32
    %93 = vector.broadcast %c15_i32_24 : i32 to vector<8x128xi32>
    %94 = arith.shrui %92, %93 : vector<8x128xi32>
    %95 = arith.xori %92, %94 : vector<8x128xi32>
    %c-2073254261_i32_25 = arith.constant -2073254261 : i32
    %96 = vector.broadcast %c-2073254261_i32_25 : i32 to vector<8x128xi32>
    %97 = arith.muli %95, %96 : vector<8x128xi32>
    %c16_i32_26 = arith.constant 16 : i32
    %98 = vector.broadcast %c16_i32_26 : i32 to vector<8x128xi32>
    %99 = arith.shrui %97, %98 : vector<8x128xi32>
    %100 = arith.xori %97, %99 : vector<8x128xi32>
    %c1717986918_i32 = arith.constant 1717986918 : i32
    %101 = vector.broadcast %c1717986918_i32 : i32 to vector<8x128xi32>
    %102 = arith.cmpi uge, %100, %101 : vector<8x128xi32>
    %cst_27 = arith.constant 0.333333343 : f32
    %cst_28 = arith.constant 0.000000e+00 : f32
    %103 = vector.broadcast %cst_27 : f32 to vector<8x128xf32>
    %104 = vector.broadcast %cst_28 : f32 to vector<8x128xf32>
    %105 = arith.select %102, %103, %104 : vector<8x128xi1>, vector<8x128xf32>
    %106 = arith.addf %82, %105 : vector<8x128xf32>
    %c-1640531527_i32_29 = arith.constant -1640531527 : i32
    %107 = vector.broadcast %c-1640531527_i32_29 : i32 to vector<8x128xi32>
    %108 = arith.muli %8, %107 : vector<8x128xi32>
    %c859201343_i32 = arith.constant 859201343 : i32
    %109 = arith.addi %9, %c859201343_i32 : i32
    %110 = vector.broadcast %109 : i32 to vector<8x128xi32>
    %111 = arith.xori %108, %110 : vector<8x128xi32>
    %c16_i32_30 = arith.constant 16 : i32
    %112 = vector.broadcast %c16_i32_30 : i32 to vector<8x128xi32>
    %113 = arith.shrui %111, %112 : vector<8x128xi32>
    %114 = arith.xori %111, %113 : vector<8x128xi32>
    %c2146121005_i32_31 = arith.constant 2146121005 : i32
    %115 = vector.broadcast %c2146121005_i32_31 : i32 to vector<8x128xi32>
    %116 = arith.muli %114, %115 : vector<8x128xi32>
    %c15_i32_32 = arith.constant 15 : i32
    %117 = vector.broadcast %c15_i32_32 : i32 to vector<8x128xi32>
    %118 = arith.shrui %116, %117 : vector<8x128xi32>
    %119 = arith.xori %116, %118 : vector<8x128xi32>
    %c-2073254261_i32_33 = arith.constant -2073254261 : i32
    %120 = vector.broadcast %c-2073254261_i32_33 : i32 to vector<8x128xi32>
    %121 = arith.muli %119, %120 : vector<8x128xi32>
    %c16_i32_34 = arith.constant 16 : i32
    %122 = vector.broadcast %c16_i32_34 : i32 to vector<8x128xi32>
    %123 = arith.shrui %121, %122 : vector<8x128xi32>
    %124 = arith.xori %121, %123 : vector<8x128xi32>
    %c-2147483648_i32 = arith.constant -2147483648 : i32
    %125 = vector.broadcast %c-2147483648_i32 : i32 to vector<8x128xi32>
    %126 = arith.cmpi uge, %124, %125 : vector<8x128xi32>
    %cst_35 = arith.constant 4.000000e-01 : f32
    %cst_36 = arith.constant 0.000000e+00 : f32
    %127 = vector.broadcast %cst_35 : f32 to vector<8x128xf32>
    %128 = vector.broadcast %cst_36 : f32 to vector<8x128xf32>
    %129 = arith.select %126, %127, %128 : vector<8x128xi1>, vector<8x128xf32>
    %130 = arith.addf %106, %129 : vector<8x128xf32>
    %131 = arith.mulf %130, %0 : vector<8x128xf32>
    %132 = arith.truncf %131 : vector<8x128xf32> to vector<8x128xbf16>
    %c0_37 = arith.constant 0 : index
    %c0_38 = arith.constant 0 : index
    %133 = vector.load %arg3[%c0_37, %c0_38] : memref<128x128xbf16, #tpu.memory_space<vmem>>, vector<128x128xbf16>
    %cst_39 = arith.constant dense<0.000000e+00> : vector<8x128xf32>
    %134 = tpu.matmul %132, %133, %cst_39 {dimension_numbers = #tpu.dot_dimension_numbers<[1], [0], [0], [1], [0, 0, 1, 1], [], []>} : vector<8x128xbf16>, vector<128x128xbf16>, vector<8x128xf32> -> vector<8x128xf32>
    %c0_40 = arith.constant 0 : index
    %c0_41 = arith.constant 0 : index
    %135 = vector.load %arg4[%c0_40, %c0_41] : memref<1x128xf32, #tpu.memory_space<vmem>>, vector<1x128xf32>
    %136 = vector.broadcast %135 : vector<1x128xf32> to vector<8x128xf32>
    %137 = arith.addf %134, %136 : vector<8x128xf32>
    %c0_42 = arith.constant 0 : index
    %c0_43 = arith.constant 0 : index
    %138 = vector.load %arg5[%c0_42, %c0_43] : memref<8x128xf32, #tpu.memory_space<vmem>>, vector<8x128xf32>
    tpu.vector_store %arg5[%c0_42, %c0_43], %137 {strides = array<i32>} : memref<8x128xf32, #tpu.memory_space<vmem>>, vector<8x128xf32>,
    return
  }
  func.func @transform_0(%arg0: i32, %arg1: memref<1xi32, #tpu.memory_space<smem>>) -> (i32, i32) {
    %c0_i32 = arith.constant 0 : i32
    %c0_i32_0 = arith.constant 0 : i32
    return %arg0, %c0_i32 : i32, i32
  }
  func.func @transform_1(%arg0: i32, %arg1: memref<1xi32, #tpu.memory_space<smem>>) -> (i32, i32) {
    %c0_i32 = arith.constant 0 : i32
    %c0_i32_0 = arith.constant 0 : i32
    %c0_i32_1 = arith.constant 0 : i32
    return %c0_i32, %c0_i32_0 : i32, i32
  }
  func.func @transform_2(%arg0: i32, %arg1: memref<1xi32, #tpu.memory_space<smem>>) -> (i32, i32) {
    %c0_i32 = arith.constant 0 : i32
    %c0_i32_0 = arith.constant 0 : i32
    %c0_i32_1 = arith.constant 0 : i32
    return %c0_i32, %c0_i32_0 : i32, i32
  }
  func.func @transform_3(%arg0: i32, %arg1: memref<1xi32, #tpu.memory_space<smem>>) -> (i32, i32) {
    %c0_i32 = arith.constant 0 : i32
    %c0_i32_0 = arith.constant 0 : i32
    return %arg0, %c0_i32 : i32, i32
  }
}

</mosaic_0001>

<bundles_post_ra>
// kernel: multi_sample_dropout.1
= control target key start
LH: loop header
LB: loop body
LE: loop exit
PB: predicated region body
PF: predicated region fallthrough
CT: control target
= control target key end

     0   :  { %10 = vsyncpa [#allocation5], 0  ;;  %s525_s0 = inlined_call_operand.<no memory space> [shape: s32[1], index: 0, kind: input, shape index: {}]   ;;  %s526_s1 = inlined_call_operand.hbm [shape: f32[8,128], index: 1, kind: input, shape index: {}]   ;;  %s527_s2 = inlined_call_operand.hbm [shape: bf16[128,128], index: 2, kind: input, shape index: {}]   ;;  %s528_s3 = inlined_call_operand.hbm [shape: f32[1,128], index: 3, kind: input, shape index: {}]   ;;  %s529_s4 = inlined_call_operand.hbm [shape: f32[8,128], index: 4, kind: output, shape index: {}]  }
   0x1   :  { %11 = vsyncpa [#allocation8], 0 }
   0x2   :  { %12 = vsyncpa [#allocation6], 0  ;;  %s415_s15 = smov [#allocation7]   ;;  %s321_s19 = scalar_lea.hbm %s527_s2, 1024 }
   0x3   :  { %s28_s16 = sshll.u32 %s415_s15, 4  ;;  %p322_p0 = scmp.ne.s32.totalorder %s527_s2, %s321_s19  ;;  %s29_s16 = int_to_ptr.vmem [resolvable:$true] %s28_s16 }
   0x4   :  { %p325_p1 = scmp.lt.u32.totalorder %s321_s19, %s527_s2 }
   0x6   :  { %p327_p2 = pnand %p325_p1, %p322_p0 }
   0x8   :  { %330 = shalt.err (!%p327_p2)
}
   0x9   :  { %s331_s24 = scalar_lea.vmem %s29_s16, 1024  ;;  %p336_p4 = scmp.lt.s32.totalorder %s29_s16, %s29_s16 }
   0xa   :  { %p332_p3 = scmp.ne.s32.totalorder %s29_s16, %s331_s24  ;;  %p337_p5 = scmp.lt.s32.totalorder %s331_s24, %s331_s24 }
   0xc   :  { %p338_p6 = por %p337_p5, %p336_p4 }
   0xe   :  { %p339_p7 = pnand %p338_p6, %p332_p3 }
  0x10   :  { %342 = shalt.err (!%p339_p7)
}
  0x11   :  { %s416_s25 = smov 64   ;;  %s417_s26 = smov 4  }
  0x12   :  { %34 = dma.hbm_to_vmem [thread:$0]  %s527_s2, 1024, %s29_s16, [#allocation8], %s416_s25, %s416_s25, %s417_s26  }
  0x13   :  { %s418_s29 = smov [#allocation4]   ;;  %s419_s5 = smov [#allocation9]  }
  0x14   :  { %s19_s30 = sshll.u32 %s418_s29, 4  ;;  %s41_s6 = sshll.u32 %s419_s5, 4  ;;  %s20_s30 = int_to_ptr.vmem [resolvable:$true] %s19_s30  ;;  %s42_s6 = int_to_ptr.vmem [resolvable:$true] %s41_s6 }
  0x15   :  { %s343_s9 = scalar_lea.hbm %s526_s1, 128 }
  0x16   :  { %p344_p8 = scmp.ne.s32.totalorder %s526_s1, %s343_s9  ;;  %p347_p9 = scmp.lt.u32.totalorder %s343_s9, %s526_s1 }
  0x18   :  { %p349_p10 = pnand %p347_p9, %p344_p8 }
  0x1a   :  { %352 = shalt.err (!%p349_p10)
}
  0x1b   :  { %s353_s2 = scalar_lea.vmem %s20_s30, 128  ;;  %p358_p12 = scmp.lt.s32.totalorder %s20_s30, %s20_s30 }
  0x1c   :  { %p354_p11 = scmp.ne.s32.totalorder %s20_s30, %s353_s2  ;;  %p359_p13 = scmp.lt.s32.totalorder %s353_s2, %s353_s2 }
  0x1e   :  { %p360_p0 = por %p359_p13, %p358_p12 }
  0x20   :  { %p361_p1 = pnand %p360_p0, %p354_p11 }
  0x22   :  { %364 = shalt.err (!%p361_p1)
}
  0x23   :  { %22 = dma.hbm_to_vmem [thread:$0]  %s526_s1, 128, %s20_s30, [#allocation5]  }
  0x24   :  { %s365_s18 = scalar_lea.hbm %s528_s3, 16 }
  0x25   :  { %p366_p2 = scmp.ne.s32.totalorder %s528_s3, %s365_s18  ;;  %p369_p3 = scmp.lt.u32.totalorder %s365_s18, %s528_s3 }
  0x27   :  { %p371_p4 = pnand %p369_p3, %p366_p2 }
  0x29   :  { %374 = shalt.err (!%p371_p4)
}
  0x2a   :  { %s375_s23 = scalar_lea.vmem %s42_s6, 16  ;;  %s379_s24 = scalar_lea.vmem %s42_s6, 32 }
  0x2b   :  { %p376_p5 = scmp.ne.s32.totalorder %s42_s6, %s375_s23  ;;  %p380_p6 = scmp.lt.s32.totalorder %s42_s6, %s42_s6 }
  0x2c   :  { %p381_p7 = scmp.lt.s32.totalorder %s379_s24, %s375_s23 }
  0x2e   :  { %p382_p8 = por %p381_p7, %p380_p6 }
  0x30   :  { %p383_p9 = pnand %p382_p8, %p376_p5 }
  0x32   :  { %386 = shalt.err (!%p383_p9)
}
  0x33   :  { %44 = dma.hbm_to_vmem [thread:$0]  %s528_s3, 16, %s42_s6, [#allocation8]  }
  0x34   :  { %409 = dma.done.wait [#allocation5], 128  }
  0x35   :  { %410 = vsyncadd [#allocation5], 4294967168 }
  0x36   :  { %411 = dma.done.wait [#allocation8], 1040  }
  0x37   :  { %412 = vsyncadd [#allocation8], 4294966256  ;;  %v56_v0 = vlaneseq  ;;  %v420_v1 = vmov 0.0   ;;  %vm421_vm0 = vmmov 0   ;;  %s67_s28 = sadd.s32 461845907, %s525_s0 }
  0x38   :  { %285 = vmatprep.subr.bf16.mxu0 %v420_v1  ;;  %301 = vmatprep.mubr.msk.bf16.mxu0 %vm421_vm0, %v420_v1  ;;  %v313_v4 = vld [vmem:[#allocation7] sm:$0xff]   ;;  %s81_s30 = sadd.s32 2708668414, %s525_s0  ;;  %v314_v6 = vld [vmem:[#allocation7 + $0x8] sm:$0xff]   ;;  %s95_s7 = sadd.s32 660523625, %s525_s0  ;;  %v68_v9 = vstv %s67_s28 }
  0x39   :  { %v57_v2 = vshrl.u32 %v56_v0, 7  ;;  %v62_v3 = vand.u32 127, %v56_v0  ;;  %286 = vmatpush3.bf16.msra.mxu0 %v313_v4  ;;  %s109_s10 = sadd.s32 2907346132, %s525_s0  ;;  %s123_s13 = sadd.s32 859201343, %s525_s0  ;;  %v82_v10 = vstv %s81_s30  ;;  %v96_v11 = vstv %s95_s7 }
  0x3a   :  { %287 = vmatprep.subr.bf16.mxu0 %v420_v1  ;;  %v315_v8 = vld [vmem:[#allocation7 + $0x10] sm:$0xff]   ;;  %v110_v12 = vstv %s109_s10  ;;  %v124_v14 = vstv %s123_s13  ;;  %v316_v15 = vld [vmem:[#allocation7 + $0x18] sm:$0xff]   ;;  %v317_v26 = vld [vmem:[#allocation7 + $0x20] sm:$0xff]   ;;  %s422_s0 = smov [#allocation10]  }
  0x3b   :  { %v63_v5 = vmul.u32 128, %v57_v2  ;;  %v318_v36 = vld [vmem:[#allocation7 + $0x28] sm:$0xff]   ;;  %v319_v47 = vld [vmem:[#allocation7 + $0x30] sm:$0xff]   ;;  %v320_v58 = vld [vmem:[#allocation7 + $0x38] sm:$0xff]   ;;  %s257_s2 = sshll.u32 %s422_s0, 4  ;;  %s258_s2 = int_to_ptr.vmem [resolvable:$true] %s257_s2 }
  0x3c   :  { %s387_s14 = scalar_lea.vmem %s258_s2, 128  ;;  %p392_p11 = scmp.lt.s32.totalorder %s258_s2, %s258_s2 }
  0x3d   :  { %v64_v7 = vadd.s32 %v63_v5, %v62_v3  ;;  %288 = vmatpush3.bf16.msra.mxu0 %v314_v6  ;;  %p388_p10 = scmp.ne.s32.totalorder %s258_s2, %s387_s14  ;;  %p393_p12 = scmp.lt.s32.totalorder %s387_s14, %s387_s14 }
  0x3e   :  { %289 = vmatprep.subr.bf16.mxu0 %v420_v1 }
  0x3f   :  { %v66_v13 = vmul.u32 2654435769, %v64_v7  ;;  %p394_p13 = por %p393_p12, %p392_p11 }
  0x41   :  { %290 = vmatpush3.bf16.msra.mxu0 %v315_v8  ;;  %v69_v16 = vxor.u32 %v68_v9, %v66_v13  ;;  %v83_v17 = vxor.u32 %v82_v10, %v66_v13  ;;  %v97_v18 = vxor.u32 %v96_v11, %v66_v13  ;;  %v111_v19 = vxor.u32 %v110_v12, %v66_v13  ;;  %v55_v10 = vld [vmem:[#allocation4] sm:$0xff]  ;;  %p395_p0 = pnand %p394_p13, %p388_p10 }
  0x42   :  { %291 = vmatprep.subr.bf16.mxu0 %v420_v1  ;;  %v125_v20 = vxor.u32 %v124_v14, %v66_v13  ;;  %v267_v14 = vld [vmem:[#allocation9] ss:$0 sm:$0xff] }
  0x43   :  { %v70_v21 = vshrl.u32 %v69_v16, 16  ;;  %v84_v22 = vshrl.u32 %v83_v17, 16  ;;  %v98_v23 = vshrl.u32 %v97_v18, 16  ;;  %v112_v24 = vshrl.u32 %v111_v19, 16 }
  0x44   :  { %v126_v25 = vshrl.u32 %v125_v20, 16 }
  0x45   :  { %292 = vmatpush3.bf16.msra.mxu0 %v316_v15  ;;  %v71_v27 = vxor.u32 %v70_v21, %v69_v16  ;;  %v85_v28 = vxor.u32 %v84_v22, %v83_v17  ;;  %v99_v29 = vxor.u32 %v98_v23, %v97_v18  ;;  %v113_v30 = vxor.u32 %v112_v24, %v111_v19 }
  0x46   :  { %293 = vmatprep.subr.bf16.mxu0 %v420_v1  ;;  %v127_v31 = vxor.u32 %v126_v25, %v125_v20 }
  0x47   :  { %v72_v32 = vmul.u32 2146121005, %v71_v27  ;;  %v86_v33 = vmul.u32 2146121005, %v85_v28 }
  0x48   :  { %v100_v34 = vmul.u32 2146121005, %v99_v29  ;;  %v114_v35 = vmul.u32 2146121005, %v113_v30 }
  0x49   :  { %294 = vmatpush3.bf16.msra.mxu0 %v317_v26  ;;  %v73_v37 = vshrl.u32 %v72_v32, 15  ;;  %v87_v38 = vshrl.u32 %v86_v33, 15  ;;  %v128_v39 = vmul.u32 2146121005, %v127_v31 }
  0x4a   :  { %295 = vmatprep.subr.bf16.mxu0 %v420_v1  ;;  %v101_v40 = vshrl.u32 %v100_v34, 15  ;;  %v115_v41 = vshrl.u32 %v114_v35, 15 }
  0x4b   :  { %v74_v42 = vxor.u32 %v73_v37, %v72_v32  ;;  %v88_v43 = vxor.u32 %v87_v38, %v86_v33  ;;  %v129_v44 = vshrl.u32 %v128_v39, 15 }
  0x4c   :  { %v102_v45 = vxor.u32 %v101_v40, %v100_v34  ;;  %v116_v46 = vxor.u32 %v115_v41, %v114_v35 }
  0x4d   :  { %296 = vmatpush3.bf16.msra.mxu0 %v318_v36  ;;  %v75_v48 = vmul.u32 2221713035, %v74_v42  ;;  %v89_v49 = vmul.u32 2221713035, %v88_v43  ;;  %v130_v50 = vxor.u32 %v129_v44, %v128_v39 }
  0x4e   :  { %297 = vmatprep.subr.bf16.mxu0 %v420_v1  ;;  %v103_v51 = vmul.u32 2221713035, %v102_v45  ;;  %v117_v52 = vmul.u32 2221713035, %v116_v46 }
  0x4f   :  { %v76_v53 = vshrl.u32 %v75_v48, 16  ;;  %v90_v54 = vshrl.u32 %v89_v49, 16  ;;  %v131_v55 = vmul.u32 2221713035, %v130_v50 }
  0x50   :  { %v104_v56 = vshrl.u32 %v103_v51, 16  ;;  %v118_v57 = vshrl.u32 %v117_v52, 16 }
  0x51   :  { %298 = vmatpush3.bf16.msra.mxu0 %v319_v47  ;;  %v77_v59 = vxor.u32 %v76_v53, %v75_v48  ;;  %v91_v60 = vxor.u32 %v90_v54, %v89_v49  ;;  %v132_v61 = vshrl.u32 %v131_v55, 16 }
  0x52   :  { %299 = vmatprep.subr.bf16.mxu0 %v420_v1  ;;  %v105_v62 = vxor.u32 %v104_v56, %v103_v51  ;;  %v119_v63 = vxor.u32 %v118_v57, %v117_v52 }
  0x53   :  { %vm78_vm1 = vcmp.ge.u32.totalorder %v77_v59, 429496730  ;;  %vm92_vm2 = vcmp.ge.u32.totalorder %v91_v60, 858993459  ;;  %v133_v0 = vxor.u32 %v132_v61, %v131_v55 }
  0x54   :  { %v79_v2 = vsel %vm78_vm1, 0.22222222, %v420_v1  ;;  %v93_v3 = vsel %vm92_vm2, 0.25, %v420_v1  ;;  %vm106_vm3 = vcmp.ge.u32.totalorder %v105_v62, 1288490189 }
  0x55   :  { %300 = vmatpush3.bf16.msra.mxu0 %v320_v58  ;;  %v94_v4 = vadd.f32 %v93_v3, %v79_v2  ;;  %v107_v5 = vsel %vm106_vm3, 0.2857143, %v420_v1  ;;  %vm120_vm4 = vcmp.ge.u32.totalorder %v119_v63, 1717986918  ;;  %vm134_vm5 = vcmp.ge.u32.totalorder %v133_v0, 2147483648 }
  0x56   :  { %v121_v6 = vsel %vm120_vm4, 0.33333334, %v420_v1  ;;  %v135_v8 = vsel %vm134_vm5, 0.4, %v420_v1 }
  0x57   :  { %v108_v7 = vadd.f32 %v107_v5, %v94_v4 }
  0x59   :  { %v122_v9 = vadd.f32 %v121_v6, %v108_v7 }
  0x5b   :  { %v136_v11 = vadd.f32 %v135_v8, %v122_v9 }
  0x5d   :  { %v137_v12 = vmul.f32 %v136_v11, %v55_v10 }
  0x5f   :  { %v138_v13 = vpack.c.bf16 %v137_v12, %v137_v12 }
  0x61   :  { %302 = vmatmul.mubr.bf16.vlgmr.msra.gmra.mrb[0].mxu0 %v138_v13 }
 0x134   :  { %v244_v15 = vpop.f32.mrb[0].mxu0 }
 0x135   :  { %v245_v16 = vadd.f32 %v267_v14, %v244_v15  ;;  %v303_v17 = vpop.f32.mrb[1].mxu0 }
 0x136   :  { %v247_v18 = vpop.f32.mrb[2].mxu0 }
 0x137   :  { %250 = vst [vmem:[#allocation10] sm:$0xff] %v245_v16  ;;  %v304_v19 = vpop.f32.mrb[3].mxu0 }
 0x138   :  { %398 = shalt.err (!%p395_p0)
}
 0x139   :  { %s399_s17 = scalar_lea.hbm %s529_s4, 128 }
 0x13a   :  { %p400_p1 = scmp.ne.s32.totalorder %s529_s4, %s399_s17  ;;  %p403_p2 = scmp.lt.u32.totalorder %s399_s17, %s529_s4 }
 0x13c   :  { %p405_p3 = pnand %p403_p2, %p400_p1 }
 0x13e   :  { %408 = shalt.err (!%p405_p3)
}
 0x13f   :  { %260 = dma.vmem_to_hbm [thread:$0]  %s258_s2, 128, %s529_s4, [#allocation6]  }
 0x140   :  { %413 = dma.done.wait [#allocation6], 128  }
 0x141   :  { %414 = vsyncadd [#allocation6], 4294967168 }
 0x142   :  { %264 = vsyncpa [#allocation5], 1 }
 0x143   :  { %265 = vsyncpa [#allocation8], 1 }
 0x144   :  { %266 = vsyncpa [#allocation6], 1 }

</bundles_post_ra>
